<compile_context>
chip_gen: v5e
topology: v5e:2x2
jax: 0.10.0
libtpu: 0.0.40
codegen_flags: <defaults>
</compile_context>

<pallas_src>
import jax
import jax.numpy as jnp
from jax import lax
from jax.experimental import pallas as pl
from jax.experimental.pallas import tpu as pltpu


def _round_up(x, m):
    return ((x + m - 1) // m) * m


def _largest_divisor_multiple(dim, align, cap):
    """Largest divisor of `dim` that is a multiple of `align` and <= cap, else None."""
    if dim % align != 0:
        return None
    best = None
    b = align
    limit = min(dim, cap)
    while b <= limit:
        if dim % b == 0:
            best = b
        b += align
    return best


def _choose_block(dim, align, cap):
    """Pick a block size along one dim.

    The returned block is a multiple of `align`.  Exact divisors of `dim` are
    preferred (no masked tail); otherwise the caller uses a cdiv grid and the
    final (tail) block is masked by Pallas.
    """
    cap = max(align, (cap // align) * align)
    if dim <= cap:
        return _round_up(dim, align)
    d = _largest_divisor_multiple(dim, align, cap)
    return d if d is not None else cap


def _frozen_bn_kernel(x_ref, scale_ref, bias_ref, o_ref):
    # x_ref:            (BM, BS) block of the flattened (N*C, H*W) input.
    # scale/bias refs:  (BM, 1)  folded per-row params, f32 (constant over j).
    # o_ref:            (BM, BS) output block, same dtype as x.
    xv = x_ref[...].astype(jnp.float32)
    o_ref[...] = (xv * scale_ref[...] + bias_ref[...]).astype(o_ref.dtype)


def frozen_batch_norm_2d(x, weight, bias, running_mean, running_var, eps=1e-5):
    """x: (N, C, H, W); per-channel params of shape (C,). Returns (N, C, H, W)."""
    N, C, H, W = x.shape
    M, S = N * C, H * W
    x2 = x.reshape(M, S)
    itemsize = jnp.dtype(x.dtype).itemsize

    # Fold the per-channel affine once in the wrapper (O(C) work).
    scale_c = weight.astype(jnp.float32) * lax.rsqrt(
        running_var.astype(jnp.float32) + jnp.float32(eps))
    bias_c = bias.astype(jnp.float32) - running_mean.astype(jnp.float32) * scale_c

    # Replicate to per-row (N*C, 1) columns (layout plumbing only).
    def rows(p):
        return jnp.broadcast_to(p[None, :], (N, C)).reshape(M, 1)

    scale_r, bias_r = rows(scale_c), rows(bias_c)

    # ---- Tile selection: byte budget + dtype-aware sublane alignment ----
    sub_align = max(8, 8 * (4 // itemsize))          # f32: 8, bf16: 16, int8: 32
    tile_budget = 4 * 1024 * 1024                    # ~4 MiB per x tile

    # Lane-dense spatial blocks (always a multiple of 128).
    BS = _choose_block(S, 128, 4096)
    # Row blocks sized so one x tile stays within the byte budget.
    max_rows = max(sub_align,
                   (tile_budget // (BS * itemsize)) // sub_align * sub_align)
    BM = _choose_block(M, sub_align, max_rows)

    gm, gs = pl.cdiv(M, BM), pl.cdiv(S, BS)

    # Ensure >= 2 grid blocks so v7x's 2 TensorCores both get work.
    if gm * gs < 2:
        if BS > 128:
            BS = max(128, _round_up(BS // 2, 128))
            gs = pl.cdiv(S, BS)
        if gm * gs < 2 and BM > sub_align:
            BM = max(sub_align, _round_up(BM // 2, sub_align))
            gm = pl.cdiv(M, BM)
    grid = (gm, gs)

    cost = pl.CostEstimate(
        flops=2 * M * S,
        transcendentals=0,
        bytes_accessed=2 * M * S * itemsize + 2 * M * 4,
    )

    # NOTE: keep j (spatial) innermost and have the param index_map ignore j,
    # so the (BM, 1) param blocks keep the same block index across j-steps and
    # their DMAs are skipped.  Do not swap the grid axes.
    row_spec = pl.BlockSpec((BM, 1), lambda i, j: (i, 0))

    out2 = pl.pallas_call(
        _frozen_bn_kernel,
        out_shape=jax.ShapeDtypeStruct((M, S), x.dtype),
        grid_spec=pltpu.PrefetchScalarGridSpec(
            num_scalar_prefetch=0,
            grid=grid,
            in_specs=[
                pl.BlockSpec((BM, BS), lambda i, j: (i, j)),
                row_spec,
                row_spec,
            ],
            out_specs=pl.BlockSpec((BM, BS), lambda i, j: (i, j)),
        ),
        compiler_params=pltpu.CompilerParams(
            dimension_semantics=("parallel", "parallel"),
            vmem_limit_bytes=32 << 20,
        ),
        cost_estimate=cost,
    )(x2, scale_r, bias_r)

    return out2.reshape(N, C, H, W)


def frozen_batch_norm_2d_reference(x, weight, bias, running_mean, running_var,
                                   eps=1e-5):
    w = weight.reshape(1, -1, 1, 1)
    b = bias.reshape(1, -1, 1, 1)
    rv = running_var.reshape(1, -1, 1, 1)
    rm = running_mean.reshape(1, -1, 1, 1)
    scale = w * lax.rsqrt(rv + eps)
    bias_t = b - rm * scale
    return x * scale + bias_t


if __name__ == "__main__":
    key = jax.random.PRNGKey(0)
    kx, kw, kb, km, kv = jax.random.split(key, 5)

    N, C, H, W = 2, 4, 16, 16
    x = jax.random.normal(kx, (N, C, H, W), dtype=jnp.float32)
    weight = 1.0 + 0.1 * jax.random.normal(kw, (C,), dtype=jnp.float32)
    bias = 0.1 * jax.random.normal(kb, (C,), dtype=jnp.float32)
    running_mean = 0.2 * jax.random.normal(km, (C,), dtype=jnp.float32)
    running_var = jax.random.uniform(kv, (C,), dtype=jnp.float32,
                                     minval=0.5, maxval=2.0)

    out = frozen_batch_norm_2d(x, weight, bias, running_mean, running_var)
    out = jax.block_until_ready(out)

    ref = frozen_batch_norm_2d_reference(x, weight, bias, running_mean,
                                         running_var)
    max_err = float(jnp.max(jnp.abs(out - ref)))
    assert out.shape == (N, C, H, W), out.shape
    assert max_err < 1e-5, f"max abs error {max_err}"

    print("KERNEL_OK")
</pallas_src>

<mosaic_0001>
module attributes {stable_mosaic.version = 11 : i64} {
  func.func @_frozen_bn_kernel(%arg0: i32, %arg1: i32, %arg2: memref<8x128xf32, #tpu.memory_space<vmem>>, %arg3: memref<8x1xf32, #tpu.memory_space<vmem>>, %arg4: memref<8x1xf32, #tpu.memory_space<vmem>>, %arg5: memref<8x128xf32, #tpu.memory_space<vmem>>) attributes {dimension_semantics = [#tpu.dimension_semantics<parallel>, #tpu.dimension_semantics<parallel>], iteration_bounds = array<i64: 1, 2>, scalar_prefetch = 0 : i64, scratch_operands = 0 : i64, tpu.core_type = #tpu.core_type<tc>, window_params = [{transform_indices = @transform_0, window_bounds = array<i64: 8, 128>}, {transform_indices = @transform_1, window_bounds = array<i64: 8, 1>}, {transform_indices = @transform_2, window_bounds = array<i64: 8, 1>}, {transform_indices = @transform_3, window_bounds = array<i64: 8, 128>}]} {
    %c0 = arith.constant 0 : index
    %c0_0 = arith.constant 0 : index
    %0 = vector.load %arg2[%c0, %c0_0] : memref<8x128xf32, #tpu.memory_space<vmem>>, vector<8x128xf32>
    %c0_1 = arith.constant 0 : index
    %c0_2 = arith.constant 0 : index
    %1 = vector.load %arg3[%c0_1, %c0_2] : memref<8x1xf32, #tpu.memory_space<vmem>>, vector<8x1xf32>
    %2 = vector.broadcast %1 : vector<8x1xf32> to vector<8x128xf32>
    %3 = arith.mulf %0, %2 : vector<8x128xf32>
    %c0_3 = arith.constant 0 : index
    %c0_4 = arith.constant 0 : index
    %4 = vector.load %arg4[%c0_3, %c0_4] : memref<8x1xf32, #tpu.memory_space<vmem>>, vector<8x1xf32>
    %5 = vector.broadcast %4 : vector<8x1xf32> to vector<8x128xf32>
    %6 = arith.addf %3, %5 : vector<8x128xf32>
    %c0_5 = arith.constant 0 : index
    %c0_6 = arith.constant 0 : index
    %7 = vector.load %arg5[%c0_5, %c0_6] : memref<8x128xf32, #tpu.memory_space<vmem>>, vector<8x128xf32>
    tpu.vector_store %arg5[%c0_5, %c0_6], %6 {strides = array<i32>} : memref<8x128xf32, #tpu.memory_space<vmem>>, vector<8x128xf32>,
    return
  }
  func.func @transform_0(%arg0: i32, %arg1: i32) -> (i32, i32) {
    %c0_i32 = arith.constant 0 : i32
    return %arg0, %arg1 : i32, i32
  }
  func.func @transform_1(%arg0: i32, %arg1: i32) -> (i32, i32) {
    %c0_i32 = arith.constant 0 : i32
    %c0_i32_0 = arith.constant 0 : i32
    return %arg0, %c0_i32 : i32, i32
  }
  func.func @transform_2(%arg0: i32, %arg1: i32) -> (i32, i32) {
    %c0_i32 = arith.constant 0 : i32
    %c0_i32_0 = arith.constant 0 : i32
    return %arg0, %c0_i32 : i32, i32
  }
  func.func @transform_3(%arg0: i32, %arg1: i32) -> (i32, i32) {
    %c0_i32 = arith.constant 0 : i32
    return %arg0, %arg1 : i32, i32
  }
}

</mosaic_0001>

<bundles_post_ra>
// kernel: tpu_custom_call.1
= control target key start
LH: loop header
LB: loop body
LE: loop exit
PB: predicated region body
PF: predicated region fallthrough
CT: control target
= control target key end

     0   :  { %8 = vsyncpa [#allocation3], 0  ;;  %s641_s0 = inlined_call_operand.vmem [shape: f32[8,256], index: 0, kind: input, shape index: {}]   ;;  %s642_s1 = inlined_call_operand.vmem [shape: f32[8,1], index: 1, kind: input, shape index: {}]   ;;  %s643_s2 = inlined_call_operand.vmem [shape: f32[8,1], index: 2, kind: input, shape index: {}]   ;;  %s644_s3 = inlined_call_operand.hbm [shape: f32[8,256], index: 3, kind: output, shape index: {}]  }
   0x1   :  { %10 = vsyncpa [#allocation3 + $0x1], 0  ;;  %s538_s12 = smov 0   ;;  %s540_s13 = smov 0  }
   0x2   :  { %s542_s14 = smov 0   ;;  %s544_s15 = smov 0  }
   0x3   :  { %s546_s16 = smov 0   ;;  %s548_s17 = smov 0  }
   0x4 LB: > { %s367_s18 = sadd.s32 4294967295, %s515_s17   ;;  %s368_s19 = sadd.s32 4294967294, %s515_s17   ;;  %s515_s17 = sphi %s548_s17, %s16_s17   ;;  %s511_s16 = sphi %s546_s16, %s651_s16   ;;  %s507_s15 = sphi %s544_s15, %s650_s15   ;;  %s503_s14 = sphi %s542_s14, %s649_s14   ;;  %s499_s13 = sphi %s540_s13, %s648_s13   ;;  %s495_s12 = sphi %s538_s12, %s647_s12  }
   0x5   : > { %s25_s20 = sadd.s32 1, %s511_s16  ;;  %s117_s21 = sadd.s32 1, %s503_s14 }
   0x6   : > { %p26_p0 = scmp.ge.s32.totalorder %s25_s20, 2  ;;  %p127_p1 = scmp.ne.s32.totalorder %s503_s14, %s499_s13 }
   0x7   : > { %p128_p2 = scmp.eq.s32.totalorder %s367_s18, 1  ;;  %p133_p3 = scmp.ne.s32.totalorder %s499_s13, %s495_s12 }
   0x8   : > { %s653_s20 = smov (%p26_p0, %s25_s20), 0  ;;  %p134_p5 = scmp.eq.s32.totalorder %s368_s19, 1 }
   0x9   : > { %p578_p4 = por %p128_p2, %p127_p1  ;;  %s113_s23 = ssub.s32 %s511_s16, %s653_s20 }
   0xa   : > { %p373_p6 = scmp.ge.s32.totalorder %s515_s17, 1  ;;  %p115_p7 = scmp.eq.s32.totalorder %s113_s23, 0 }
   0xb   : > { %p585_p8 = por %p134_p5, %p133_p3  ;;  %p177_p9 = scmp.lt.s32.totalorder %s515_s17, 3 }
   0xc   : > { %s591_s25 = scalar_select %p115_p7, %s503_s14, %s117_s21  }
   0xd   : > { %p178_p10 = pnand %p373_p6, %p177_p9 }
   0xe   : > { %p214_p11 = scmp.lt.s32.totalorder (!%p178_p10), %s507_s15, 1  ;;  %s209_s4 = sand.u32 (!%p178_p10), 1, %s499_s13  }
   0xf   : > { %181 = sbr.rel (%p178_p10) target bundleno = 150 (0x96), region = 32  ;;  %s374_s6 = sshll.u32 (!%p178_p10), %s209_s4, 3 }
  0x10   : > { %s377_s7 = sshll.u32 (!%p178_p10), %s507_s15, 3  ;;  %s211_s21 = scalar_lea.vmem (!%p178_p10), [#allocation2], %s374_s6 }
  0x11   : > { %s257_s19 = scalar_lea.hbm (!%p178_p10), %s644_s3, %s377_s7  ;;  %s259_s23 = sshll.u32 (!%p178_p10), %s211_s21, 4  ;;  %s260_s23 = int_to_ptr.vmem [resolvable:$true] %s259_s23 }
  0x12   : > { %s261_s26 = sshll.u32 (!%p178_p10), %s257_s19, 4  ;;  %s262_s26 = int_to_ptr.hbm [resolvable:$true] %s261_s26 }
  0x13   : > { %s451_s27 = sshra.s32 (!%p178_p10), %s262_s26, 4  ;;  %s452_s27 = int_to_ptr.hbm [resolvable:$true] %s451_s27 }
  0x14   : > { %v229_v0 = vld [vmem:[%s642_s1] sm:$0xff]  ;;  %v517_v1 = vmov 0   ;;  %s215_s30 = scalar_select %p214_p11, %s507_s15, 1 }
  0x15   : > { %436 = vset.pattern.permute.xlu0 %v517_v1  ;;  %v236_v2 = vld [vmem:[%s643_s2] sm:$0xff]  ;;  %s245_s15 = scalar_lea.sflag [#allocation3], %s209_s4  ;;  %s453_s28 = scalar_lea.hbm %s452_s27, 8 }
  0x16   : > { %232 = vperm.xlu0 %436, %v229_v0   ;;  %s375_s5 = sshll.u32 %s215_s30, 3  ;;  %p454_p12 = scmp.ne.s32.totalorder %s452_s27, %s453_s28 }
  0x17   : > { %s219_s10 = scalar_lea.vmem %s641_s0, %s375_s5  ;;  %s457_s5 = scalar_lea.hbm %s644_s3, 16 }
  0x18   : > { %v228_v4 = vld [vmem:[%s219_s10] sm:$0xff]  ;;  %p455_p13 = pnand %p454_p12, %p578_p4  ;;  %p458_p1 = scmp.lt.s32.totalorder %s452_s27, %s644_s3 }
  0x19   : > { %p459_p2 = scmp.lt.s32.totalorder %s457_s5, %s453_s28 }
  0x1a   : > { %p456_p0 = pneg %p455_p13 }
  0x1b   : > { %p460_p3 = por %p459_p2, %p458_p1 }
  0x1d   : > { %p461_p5 = pnand %p460_p3, %p456_p0 }
  0x1e   : > { %239 = vperm.xlu0 %436, %v236_v2  }
  0x88   : > { %v233_v3 = vpop.permute.xlu0 %232 }
  0x89   : > { %v235_v5 = vmul.f32 %v233_v3, %v228_v4 }
  0x90   : > { %v240_v6 = vpop.permute.xlu0 %239 }
  0x91   : > { %v242_v7 = vadd.f32 %v240_v6, %v235_v5 }
  0x93   : > { %243 = vst [vmem:[%s211_s21] sm:$0xff] %v242_v7 }
  0x94   : > { %464 = shalt.err (!%p461_p5)
}
  0x95   : > { %380 = dma.vmem_to_hbm [thread:$0]  (%p578_p4), %s260_s23, 128, %s262_s26, %s245_s15  }
  0x96 PF: > { %p386_p6 = scmp.ge.s32.totalorder %s515_s17, 2  ;;  %s273_s4 = sand.u32 1, %s495_s12  }
  0x97   : > { %s274_s8 = scalar_lea.sflag [#allocation3], %s273_s4 }
  0x98   : > { %p383_p7 = pnand %p386_p6, %p585_p8 }
  0x9a   : > { %p384_p9 = pneg %p383_p7 }
  0x9c   : > { %490 = dma.done.wait (%p384_p9), %s274_s8, 128  }
  0x9d   : > { %492 = vsyncadd (%p384_p9), %s274_s8, 4294967168  ;;  %s16_s17 = sadd.s32 1, %s515_s17   ;;  %s647_s12 = smov %s499_s13 }
  0x9e   : > { %p13_p10 = scmp.ge.s32.totalorder %s16_s17, 4   ;;  %s648_s13 = smov %s503_s14 }
  0x9f   : > { %s649_s14 = smov %s591_s25  ;;  %s650_s15 = smov %s511_s16 }
  0xa0   : > { %s651_s16 = smov %s653_s20  ;;  %15 = sbr.rel (!%p13_p10) target bundleno = 4 (0x4), region = 73 }
  0xa5   :  { %280 = vsyncpa [#allocation3], 1 }
  0xa6   :  { %282 = vsyncpa [#allocation3 + $0x1], 1 }

</bundles_post_ra>
